<compile_context>
chip_gen: v7x
topology: tpu7x:2x2x1
jax: 0.10.0
libtpu: 0.0.40
codegen_flags: <defaults>
</compile_context>

<pallas_src>
import functools
import math

import jax
import jax.numpy as jnp
from jax.experimental import pallas as pl
from jax.experimental.pallas import tpu as pltpu


def _round_up(n, m):
    return ((n + m - 1) // m) * m


def _grid_steps():
    """1 grid step on single-TensorCore chips (v5e/v6e), 2 on dual-TC chips."""
    try:
        kind = jax.devices()[0].device_kind.lower()
    except Exception:
        return 1
    single_tc = ("v5e", "v5 lite", "v5litepod", "v6e", "v6 lite", "v6litepod")
    return 1 if any(tag in kind for tag in single_tc) else 2


def ae_kernel(x_ref, w1_ref, b1_ref, w2_ref, b2_ref,
              w3_ref, b3_ref, w4_ref, b4_ref, out_ref, *, compute_dtype):
    """linear->relu->linear->linear->relu->linear on one batch-major tile."""
    cdt = compute_dtype

    def linear(a, w_ref, b_ref):
        # a: [tb, k] (compute dtype), w: [n, k] (PyTorch nn.Linear layout),
        # b: [1, n] f32.  Contract a dim 1 with w dim 1 (i.e. a @ W^T) on the
        # MXU with f32 accumulation; bias-add stays in f32 on the VPU.
        y = jax.lax.dot_general(
            a, w_ref[...].astype(cdt),
            dimension_numbers=(((1,), (1,)), ((), ())),
            preferred_element_type=jnp.float32)
        return y + b_ref[...]

    x = x_ref[...].astype(cdt)                                      # [tb, in]
    h = jnp.maximum(linear(x, w1_ref, b1_ref), 0.0)                 # Encoder.fc1
    emb = linear(h.astype(cdt), w2_ref, b2_ref)                     # Encoder.fc2
    d = jnp.maximum(linear(emb.astype(cdt), w3_ref, b3_ref), 0.0)   # Decoder.fc1
    out = linear(d.astype(cdt), w4_ref, b4_ref)                     # Decoder.fc2
    out_ref[...] = out.astype(out_ref.dtype)


def ae_forward(x, w1, b1, w2, b2, w3, b3, w4, b4, *, compute_dtype=jnp.bfloat16):
    """AE forward. x: [B, in_dims] -> [B, out_dims] (same dtype as x)."""
    B, in_dims = x.shape
    hid_dims = w1.shape[0]
    out_dims = w4.shape[0]
    assert w1.shape == (hid_dims, in_dims)
    assert w2.shape == (hid_dims, hid_dims)
    assert w3.shape == (out_dims, hid_dims)
    assert w4.shape == (out_dims, out_dims)

    steps = _grid_steps()                      # 1 (v5e/v6e) or 2 (dual-TC chips)
    B_pad = _round_up(B, 8 * steps)            # sublane-aligned per-core tile
    tb = B_pad // steps
    if B_pad != B:
        # Padded rows compute relu(b)-style garbage; sliced off before return.
        x = jnp.pad(x, ((0, B_pad - B), (0, 0)))

    # Biases as [1, n] rows so the in-kernel broadcast add is layout-trivial.
    b1r = b1.astype(jnp.float32).reshape(1, hid_dims)
    b2r = b2.astype(jnp.float32).reshape(1, hid_dims)
    b3r = b3.astype(jnp.float32).reshape(1, out_dims)
    b4r = b4.astype(jnp.float32).reshape(1, out_dims)

    def const_spec(arr):
        # Whole (tiny) array resident in VMEM; constant block index => fetched
        # once, never re-DMA'd across the grid steps.
        # NOTE: block shapes equal the full array dims, which is what makes the
        # sub-(8,128) feature dims legal.
        return pl.BlockSpec(arr.shape, lambda i, _n=arr.ndim: (0,) * _n)

    # Advisory cost for XLA's scheduler around this custom call.
    flops = 2 * B_pad * (in_dims * hid_dims + hid_dims * hid_dims
                         + hid_dims * out_dims + out_dims * out_dims)
    param_bytes = sum(int(a.size) * a.dtype.itemsize
                      for a in (w1, w2, w3, w4, b1r, b2r, b3r, b4r))
    bytes_accessed = (int(x.size) * x.dtype.itemsize
                      + B_pad * out_dims * x.dtype.itemsize
                      + param_bytes)

    out = pl.pallas_call(
        functools.partial(ae_kernel, compute_dtype=compute_dtype),
        out_shape=jax.ShapeDtypeStruct((B_pad, out_dims), x.dtype),
        grid_spec=pltpu.PrefetchScalarGridSpec(
            num_scalar_prefetch=0,
            grid=(steps,),
            in_specs=[
                pl.BlockSpec((tb, in_dims), lambda i: (i, 0)),    # batch tile
                const_spec(w1), const_spec(b1r),
                const_spec(w2), const_spec(b2r),
                const_spec(w3), const_spec(b3r),
                const_spec(w4), const_spec(b4r),
            ],
            out_specs=pl.BlockSpec((tb, out_dims), lambda i: (i, 0)),
        ),
        compiler_params=pltpu.CompilerParams(
            # Shards the (at most 2) batch tiles across TensorCores on
            # dual-TC chips; harmless on single-TC chips.  Default scoped VMEM
            # is ample (working set < 2 MiB), so no vmem_limit override.
            dimension_semantics=("parallel",),
        ),
        cost_estimate=pl.CostEstimate(
            flops=flops, transcendentals=0, bytes_accessed=bytes_accessed),
    )(x, w1, b1r, w2, b2r, w3, b3r, w4, b4r)

    if B_pad != B:
        out = out[:B]
    return out


def init_linear(key, in_features, out_features):
    """nn.Linear-style init: W [out, in], b [out], U(-1/sqrt(fan_in), +)."""
    kw, kb = jax.random.split(key)
    bound = 1.0 / math.sqrt(in_features)
    w = jax.random.uniform(kw, (out_features, in_features), jnp.float32,
                           minval=-bound, maxval=bound)
    b = jax.random.uniform(kb, (out_features,), jnp.float32,
                           minval=-bound, maxval=bound)
    return w, b


def ae_reference(x, w1, b1, w2, b2, w3, b3, w4, b4, compute_dtype=jnp.float32):
    """Pure-JAX reference (optionally with the same bf16-matmul recipe)."""
    cd = compute_dtype

    def lin(a, w, b):
        return jnp.dot(a.astype(cd), w.astype(cd).T,
                       preferred_element_type=jnp.float32) + b

    h = jnp.maximum(lin(x, w1, b1), 0.0)
    emb = lin(h, w2, b2)
    d = jnp.maximum(lin(emb, w3, b3), 0.0)
    out = lin(d, w4, b4)
    return out.astype(x.dtype)


if __name__ == "__main__":
    key = jax.random.PRNGKey(0)
    k_x, k1, k2, k3, k4 = jax.random.split(key, 5)

    # AE(input_dims, hid_dims, out_dims) on a small batch.
    batch, input_dims, hid_dims, out_dims = 256, 16, 32, 16
    x = jax.random.normal(k_x, (batch, input_dims), jnp.float32)

    w1, b1 = init_linear(k1, input_dims, hid_dims)   # Encoder.fc1
    w2, b2 = init_linear(k2, hid_dims, hid_dims)     # Encoder.fc2
    w3, b3 = init_linear(k3, hid_dims, out_dims)     # Decoder.fc1
    w4, b4 = init_linear(k4, out_dims, out_dims)     # Decoder.fc2
    params = (w1, b1, w2, b2, w3, b3, w4, b4)

    fwd = jax.jit(ae_forward)
    out = jax.block_until_ready(fwd(x, *params))
    assert out.shape == (batch, out_dims)

    # Check against a pure-JAX reference using the same bf16-matmul / f32-accum
    # recipe, plus a looser sanity check against full-f32 math.
    ref_bf16 = ae_reference(x, *params, compute_dtype=jnp.bfloat16)
    assert jnp.allclose(out, ref_bf16, atol=2e-2, rtol=2e-2), "mismatch vs bf16 ref"

    ref_f32 = ae_reference(x, *params, compute_dtype=jnp.float32)
    assert jnp.allclose(out, ref_f32, atol=1e-1, rtol=1e-1), "mismatch vs f32 ref"

    print("KERNEL_OK")
</pallas_src>

<mosaic_0001>
module attributes {stable_mosaic.version = 11 : i64} {
  func.func @ae_kernel(%arg0: i32, %arg1: memref<128x16xf32, #tpu.memory_space<vmem>>, %arg2: memref<32x16xf32, #tpu.memory_space<vmem>>, %arg3: memref<1x32xf32, #tpu.memory_space<vmem>>, %arg4: memref<32x32xf32, #tpu.memory_space<vmem>>, %arg5: memref<1x32xf32, #tpu.memory_space<vmem>>, %arg6: memref<16x32xf32, #tpu.memory_space<vmem>>, %arg7: memref<1x16xf32, #tpu.memory_space<vmem>>, %arg8: memref<16x16xf32, #tpu.memory_space<vmem>>, %arg9: memref<1x16xf32, #tpu.memory_space<vmem>>, %arg10: memref<128x16xf32, #tpu.memory_space<vmem>>) attributes {dimension_semantics = [#tpu.dimension_semantics<parallel>], iteration_bounds = array<i64: 2>, scalar_prefetch = 0 : i64, scratch_operands = 0 : i64, tpu.core_type = #tpu.core_type<tc>, window_params = [{transform_indices = @transform_0, window_bounds = array<i64: 128, 16>}, {pipeline_mode = #tpu.pipeline_mode<synchronous>, transform_indices = @transform_1, window_bounds = array<i64: 32, 16>}, {pipeline_mode = #tpu.pipeline_mode<synchronous>, transform_indices = @transform_2, window_bounds = array<i64: 1, 32>}, {pipeline_mode = #tpu.pipeline_mode<synchronous>, transform_indices = @transform_3, window_bounds = array<i64: 32, 32>}, {pipeline_mode = #tpu.pipeline_mode<synchronous>, transform_indices = @transform_4, window_bounds = array<i64: 1, 32>}, {pipeline_mode = #tpu.pipeline_mode<synchronous>, transform_indices = @transform_5, window_bounds = array<i64: 16, 32>}, {pipeline_mode = #tpu.pipeline_mode<synchronous>, transform_indices = @transform_6, window_bounds = array<i64: 1, 16>}, {pipeline_mode = #tpu.pipeline_mode<synchronous>, transform_indices = @transform_7, window_bounds = array<i64: 16, 16>}, {pipeline_mode = #tpu.pipeline_mode<synchronous>, transform_indices = @transform_8, window_bounds = array<i64: 1, 16>}, {transform_indices = @transform_9, window_bounds = array<i64: 128, 16>}]} {
    %c0 = arith.constant 0 : index
    %c0_0 = arith.constant 0 : index
    %0 = vector.load %arg1[%c0, %c0_0] : memref<128x16xf32, #tpu.memory_space<vmem>>, vector<128x16xf32>
    %1 = arith.truncf %0 : vector<128x16xf32> to vector<128x16xbf16>
    %c0_1 = arith.constant 0 : index
    %c0_2 = arith.constant 0 : index
    %2 = vector.load %arg2[%c0_1, %c0_2] : memref<32x16xf32, #tpu.memory_space<vmem>>, vector<32x16xf32>
    %3 = arith.truncf %2 : vector<32x16xf32> to vector<32x16xbf16>
    %cst = arith.constant dense<0.000000e+00> : vector<128x32xf32>
    %4 = tpu.matmul %1, %3, %cst {dimension_numbers = #tpu.dot_dimension_numbers<[1], [1], [0], [0], [0, 0, 1, 0], [], []>} : vector<128x16xbf16>, vector<32x16xbf16>, vector<128x32xf32> -> vector<128x32xf32>
    %c0_3 = arith.constant 0 : index
    %c0_4 = arith.constant 0 : index
    %5 = vector.load %arg3[%c0_3, %c0_4] : memref<1x32xf32, #tpu.memory_space<vmem>>, vector<1x32xf32>
    %6 = vector.broadcast %5 : vector<1x32xf32> to vector<128x32xf32>
    %7 = arith.addf %4, %6 : vector<128x32xf32>
    %cst_5 = arith.constant 0.000000e+00 : f32
    %8 = vector.broadcast %cst_5 : f32 to vector<128x32xf32>
    %9 = arith.maximumf %7, %8 : vector<128x32xf32>
    %10 = arith.truncf %9 : vector<128x32xf32> to vector<128x32xbf16>
    %c0_6 = arith.constant 0 : index
    %c0_7 = arith.constant 0 : index
    %11 = vector.load %arg4[%c0_6, %c0_7] : memref<32x32xf32, #tpu.memory_space<vmem>>, vector<32x32xf32>
    %12 = arith.truncf %11 : vector<32x32xf32> to vector<32x32xbf16>
    %cst_8 = arith.constant dense<0.000000e+00> : vector<128x32xf32>
    %13 = tpu.matmul %10, %12, %cst_8 {dimension_numbers = #tpu.dot_dimension_numbers<[1], [1], [0], [0], [0, 0, 1, 0], [], []>} : vector<128x32xbf16>, vector<32x32xbf16>, vector<128x32xf32> -> vector<128x32xf32>
    %c0_9 = arith.constant 0 : index
    %c0_10 = arith.constant 0 : index
    %14 = vector.load %arg5[%c0_9, %c0_10] : memref<1x32xf32, #tpu.memory_space<vmem>>, vector<1x32xf32>
    %15 = vector.broadcast %14 : vector<1x32xf32> to vector<128x32xf32>
    %16 = arith.addf %13, %15 : vector<128x32xf32>
    %17 = arith.truncf %16 : vector<128x32xf32> to vector<128x32xbf16>
    %c0_11 = arith.constant 0 : index
    %c0_12 = arith.constant 0 : index
    %18 = vector.load %arg6[%c0_11, %c0_12] : memref<16x32xf32, #tpu.memory_space<vmem>>, vector<16x32xf32>
    %19 = arith.truncf %18 : vector<16x32xf32> to vector<16x32xbf16>
    %cst_13 = arith.constant dense<0.000000e+00> : vector<128x16xf32>
    %20 = tpu.matmul %17, %19, %cst_13 {dimension_numbers = #tpu.dot_dimension_numbers<[1], [1], [0], [0], [0, 0, 1, 0], [], []>} : vector<128x32xbf16>, vector<16x32xbf16>, vector<128x16xf32> -> vector<128x16xf32>
    %c0_14 = arith.constant 0 : index
    %c0_15 = arith.constant 0 : index
    %21 = vector.load %arg7[%c0_14, %c0_15] : memref<1x16xf32, #tpu.memory_space<vmem>>, vector<1x16xf32>
    %22 = vector.broadcast %21 : vector<1x16xf32> to vector<128x16xf32>
    %23 = arith.addf %20, %22 : vector<128x16xf32>
    %cst_16 = arith.constant 0.000000e+00 : f32
    %24 = vector.broadcast %cst_16 : f32 to vector<128x16xf32>
    %25 = arith.maximumf %23, %24 : vector<128x16xf32>
    %26 = arith.truncf %25 : vector<128x16xf32> to vector<128x16xbf16>
    %c0_17 = arith.constant 0 : index
    %c0_18 = arith.constant 0 : index
    %27 = vector.load %arg8[%c0_17, %c0_18] : memref<16x16xf32, #tpu.memory_space<vmem>>, vector<16x16xf32>
    %28 = arith.truncf %27 : vector<16x16xf32> to vector<16x16xbf16>
    %cst_19 = arith.constant dense<0.000000e+00> : vector<128x16xf32>
    %29 = tpu.matmul %26, %28, %cst_19 {dimension_numbers = #tpu.dot_dimension_numbers<[1], [1], [0], [0], [0, 0, 1, 0], [], []>} : vector<128x16xbf16>, vector<16x16xbf16>, vector<128x16xf32> -> vector<128x16xf32>
    %c0_20 = arith.constant 0 : index
    %c0_21 = arith.constant 0 : index
    %30 = vector.load %arg9[%c0_20, %c0_21] : memref<1x16xf32, #tpu.memory_space<vmem>>, vector<1x16xf32>
    %31 = vector.broadcast %30 : vector<1x16xf32> to vector<128x16xf32>
    %32 = arith.addf %29, %31 : vector<128x16xf32>
    %c0_22 = arith.constant 0 : index
    %c0_23 = arith.constant 0 : index
    %33 = vector.load %arg10[%c0_22, %c0_23] : memref<128x16xf32, #tpu.memory_space<vmem>>, vector<128x16xf32>
    tpu.vector_store %arg10[%c0_22, %c0_23], %32 {strides = array<i32>} : memref<128x16xf32, #tpu.memory_space<vmem>>, vector<128x16xf32>,
    return
  }
  func.func @transform_0(%arg0: i32) -> (i32, i32) {
    %c0_i32 = arith.constant 0 : i32
    %c0_i32_0 = arith.constant 0 : i32
    return %arg0, %c0_i32 : i32, i32
  }
  func.func @transform_1(%arg0: i32) -> (i32, i32) {
    %c0_i32 = arith.constant 0 : i32
    %c0_i32_0 = arith.constant 0 : i32
    %c0_i32_1 = arith.constant 0 : i32
    return %c0_i32, %c0_i32_0 : i32, i32
  }
  func.func @transform_2(%arg0: i32) -> (i32, i32) {
    %c0_i32 = arith.constant 0 : i32
    %c0_i32_0 = arith.constant 0 : i32
    %c0_i32_1 = arith.constant 0 : i32
    return %c0_i32, %c0_i32_0 : i32, i32
  }
  func.func @transform_3(%arg0: i32) -> (i32, i32) {
    %c0_i32 = arith.constant 0 : i32
    %c0_i32_0 = arith.constant 0 : i32
    %c0_i32_1 = arith.constant 0 : i32
    return %c0_i32, %c0_i32_0 : i32, i32
  }
  func.func @transform_4(%arg0: i32) -> (i32, i32) {
    %c0_i32 = arith.constant 0 : i32
    %c0_i32_0 = arith.constant 0 : i32
    %c0_i32_1 = arith.constant 0 : i32
    return %c0_i32, %c0_i32_0 : i32, i32
  }
  func.func @transform_5(%arg0: i32) -> (i32, i32) {
    %c0_i32 = arith.constant 0 : i32
    %c0_i32_0 = arith.constant 0 : i32
    %c0_i32_1 = arith.constant 0 : i32
    return %c0_i32, %c0_i32_0 : i32, i32
  }
  func.func @transform_6(%arg0: i32) -> (i32, i32) {
    %c0_i32 = arith.constant 0 : i32
    %c0_i32_0 = arith.constant 0 : i32
    %c0_i32_1 = arith.constant 0 : i32
    return %c0_i32, %c0_i32_0 : i32, i32
  }
  func.func @transform_7(%arg0: i32) -> (i32, i32) {
    %c0_i32 = arith.constant 0 : i32
    %c0_i32_0 = arith.constant 0 : i32
    %c0_i32_1 = arith.constant 0 : i32
    return %c0_i32, %c0_i32_0 : i32, i32
  }
  func.func @transform_8(%arg0: i32) -> (i32, i32) {
    %c0_i32 = arith.constant 0 : i32
    %c0_i32_0 = arith.constant 0 : i32
    %c0_i32_1 = arith.constant 0 : i32
    return %c0_i32, %c0_i32_0 : i32, i32
  }
  func.func @transform_9(%arg0: i32) -> (i32, i32) {
    %c0_i32 = arith.constant 0 : i32
    %c0_i32_0 = arith.constant 0 : i32
    return %arg0, %c0_i32 : i32, i32
  }
}

</mosaic_0001>

<bundles_post_ra>
// kernel: ae_forward.1
= control target key start
LH: loop header
LB: loop body
LE: loop exit
PB: predicated region body
PF: predicated region fallthrough
CT: control target
= control target key end

     0   :  { %s1272_s30 = smov 0   ;;  %s1440_s0 = inlined_call_operand.vmem [shape: f32[256,16], index: 0, kind: input, shape index: {}]   ;;  %s1441_s1 = inlined_call_operand.vmem [shape: f32[32,16], index: 1, kind: input, shape index: {}]   ;;  %s1442_s2 = inlined_call_operand.vmem [shape: f32[1,32], index: 2, kind: input, shape index: {}]   ;;  %s1443_s3 = inlined_call_operand.vmem [shape: f32[32,32], index: 3, kind: input, shape index: {}]   ;;  %s1444_s4 = inlined_call_operand.vmem [shape: f32[1,32], index: 4, kind: input, shape index: {}]   ;;  %s1445_s5 = inlined_call_operand.vmem [shape: f32[16,32], index: 5, kind: input, shape index: {}]   ;;  %s1446_s6 = inlined_call_operand.vmem [shape: f32[1,16], index: 6, kind: input, shape index: {}]   ;;  %s1447_s7 = inlined_call_operand.vmem [shape: f32[16,16], index: 7, kind: input, shape index: {}]   ;;  %s1448_s8 = inlined_call_operand.vmem [shape: f32[1,16], index: 8, kind: input, shape index: {}]   ;;  %s1449_s9 = inlined_call_operand.vmem [shape: f32[256,16], index: 9, kind: output, shape index: {}]  }
   0x1 LB: > { %s1039_s10 = sadd.s32 4294967295, %s1220_s30   ;;  %p1043_p0 = scmp.ge.s32.totalorder %s1220_s30, 1  ;;  %s1220_s30 = sphi %s1272_s30, %s19_s30  }
   0x2   : > { %p288_p1 = scmp.lt.s32.totalorder %s1220_s30, 3 }
   0x4   : > { %p289_p2 = pnand %p1043_p0, %p288_p1 }
   0x5   : > { %v361_v0 = vld [vmem:[%s1441_s1] sm:$0xff] (!%p289_p2)  ;;  %v362_v1 = vld [vmem:[%s1441_s1 + $0x8] sm:$0xff] (!%p289_p2)  ;;  %vm374_vm0 = vcmask (!%p289_p2), 130048   ;;  %v363_v2 = vld [vmem:[%s1441_s1 + $0x10] sm:$0xff] (!%p289_p2)  ;;  %s1044_s17 = sshll.u32 (!%p289_p2), %s1039_s10, 4  ;;  %vm539_vm1 = vcmask (!%p289_p2), 261120  }
   0x6   : > { %292 = sbr.rel (%p289_p2) target bundleno = 930 (0x3a2), region = 56  ;;  %v365_v3 = vpack.c.bf16 (!%p289_p2), %v362_v1, %v361_v0  ;;  %v364_v4 = vld [vmem:[%s1441_s1 + $0x18] sm:$0xff] (!%p289_p2)  ;;  %p325_p3 = scmp.lt.s32.totalorder (!%p289_p2), %s1044_s17, 31  ;;  %v526_v5 = vld [vmem:[%s1443_s3] sm:$0xff] (!%p289_p2)  ;;  %v527_v6 = vld [vmem:[%s1443_s3 + $0x8] sm:$0xff] (!%p289_p2) }
   0x7   : > { %v366_v7 = vpack.c.bf16 (!%p289_p2), %v364_v4, %v363_v2  ;;  %v530_v8 = vpack.c.bf16 (!%p289_p2), %v527_v6, %v526_v5  ;;  %v528_v36 = vld [vmem:[%s1443_s3 + $0x10] sm:$0xff] (!%p289_p2)  ;;  %v529_v37 = vld [vmem:[%s1443_s3 + $0x18] sm:$0xff] (!%p289_p2)  ;;  %v675_v40 = vld [vmem:[%s1445_s5] sm:$0xff] (!%p289_p2) }
   0x8   : > { %1200 = vmatprep.subr.msk.bf16.mxu0 (!%p289_p2), %vm374_vm0, %v365_v3  ;;  %v400_v9 = vsel (!%p289_p2), %vm374_vm0, %v365_v3, 0  ;;  %v531_v38 = vpack.c.bf16 (!%p289_p2), %v529_v37, %v528_v36  ;;  %v676_v41 = vld [vmem:[%s1445_s5 + $0x8] sm:$0xff] (!%p289_p2)  ;;  %v1048_v44 = vld [vmem:[%s1442_s2] ss:$0 sm:$0xff] (!%p289_p2) }
   0x9   : > { %1125 = vmatpush3.bf16.xpose.msra.mxu0 (!%p289_p2), %v400_v9  ;;  %1202 = vmatprep.subr.msk.bf16.mxu1 (!%p289_p2), %vm539_vm1, %v530_v8  ;;  %v565_v10 = vsel (!%p289_p2), %vm539_vm1, %v530_v8, 0  ;;  %v403_v14 = vsel (!%p289_p2), %vm374_vm0, %v366_v7, 0  ;;  %v677_v42 = vpack.c.bf16 (!%p289_p2), %v676_v41, %v675_v40  ;;  %v833_v37 = vld [vmem:[%s1447_s7] sm:$0xff] (!%p289_p2) }
   0xa   : > { %1201 = vmatprep.subr.msk.bf16.mxu0 (!%p289_p2), %vm374_vm0, %v366_v7  ;;  %1145 = vmatpush3.bf16.xpose.msra.mxu1 (!%p289_p2), %v565_v10  ;;  %v568_v39 = vsel (!%p289_p2), %vm539_vm1, %v531_v38, 0 }
   0xb   : > { %1203 = vmatprep.subr.msk.bf16.mxu1 (!%p289_p2), %vm539_vm1, %v531_v38  ;;  %v710_v43 = vsel (!%p289_p2), %vm539_vm1, %v677_v42, 0  ;;  %v834_v38 = vld [vmem:[%s1447_s7 + $0x8] sm:$0xff] (!%p289_p2) }
   0xd   : > { %s1451_s17 = smov (!%p325_p3, %s1044_s17), 31 }
   0xe   : > { %s1045_s24 = sshll.u32 %s1451_s17, 3 }
   0xf   : > { %s1311_s27 = scalar_lea.vmem %s1440_s0, %s1045_s24  ;;  %s1403_s12 = scalar_lea.vmem %s1449_s9, %s1045_s24 }
  0x10   : > { %v337_v11 = vld [vmem:[%s1311_s27] sm:$0xff]  ;;  %v338_v12 = vld [vmem:[%s1311_s27 + $0x8] sm:$0xff]  ;;  %v339_v15 = vld [vmem:[%s1311_s27 + $0x10] sm:$0xff] }
  0x11   : > { %v353_v13 = vpack.c.bf16 %v338_v12, %v337_v11  ;;  %1127 = vmatpush3.bf16.xpose.msra.mxu0 %v403_v14  ;;  %v340_v16 = vld [vmem:[%s1311_s27 + $0x18] sm:$0xff]  ;;  %v341_v17 = vld [vmem:[%s1311_s27 + $0x20] sm:$0xff]  ;;  %v342_v18 = vld [vmem:[%s1311_s27 + $0x28] sm:$0xff] }
  0x12   : > { %v354_v19 = vpack.c.bf16 %v340_v16, %v339_v15  ;;  %v355_v20 = vpack.c.bf16 %v342_v18, %v341_v17  ;;  %v343_v21 = vld [vmem:[%s1311_s27 + $0x30] sm:$0xff]  ;;  %v344_v22 = vld [vmem:[%s1311_s27 + $0x38] sm:$0xff]  ;;  %v345_v23 = vld [vmem:[%s1311_s27 + $0x40] sm:$0xff]  ;;  %1147 = vmatpush3.bf16.xpose.msra.mxu1 %v568_v39  ;;  %1204 = vmatprep.subr.msk.bf16.mxu0 %vm539_vm1, %v677_v42  ;;  %v835_v39 = vpack.c.bf16 %v834_v38, %v833_v37 }
  0x13   : > { %1128 = vmatprep.mubr.msk.bf16.mxu0 %vm374_vm0, %v353_v13  ;;  %v346_v24 = vld [vmem:[%s1311_s27 + $0x48] sm:$0xff]  ;;  %v356_v25 = vpack.c.bf16 %v344_v22, %v343_v21  ;;  %v347_v27 = vld [vmem:[%s1311_s27 + $0x50] sm:$0xff]  ;;  %v348_v28 = vld [vmem:[%s1311_s27 + $0x58] sm:$0xff] }
  0x14   : > { %v357_v26 = vpack.c.bf16 %v346_v24, %v345_v23  ;;  %v349_v29 = vld [vmem:[%s1311_s27 + $0x60] sm:$0xff]  ;;  %v350_v30 = vld [vmem:[%s1311_s27 + $0x68] sm:$0xff]  ;;  %v358_v31 = vpack.c.bf16 %v348_v28, %v347_v27  ;;  %v351_v33 = vld [vmem:[%s1311_s27 + $0x70] sm:$0xff]  ;;  %1205 = vmatprep.subr.msk.bf16.mxu1 %vm374_vm0, %v835_v39  ;;  %v868_v40 = vsel %vm374_vm0, %v835_v39, 0 }
  0x15   : > { %v359_v32 = vpack.c.bf16 %v350_v30, %v349_v29  ;;  %v352_v34 = vld [vmem:[%s1311_s27 + $0x78] sm:$0xff]  ;;  %v1057_v42 = vld [vmem:[%s1444_s4] ss:$0 sm:$0xff] }
  0x16   : > { %v360_v35 = vpack.c.bf16 %v352_v34, %v351_v33 }
  0x18   : > { %1129 = vmatmul.mubr.msk.bf16.vlgmr.msra.gmra.mrb[0].mxu0 %vm374_vm0, %v354_v19 }
  0x19   : > { %1132 = vmatprep.mubr.msk.bf16.mxu0 %vm374_vm0, %v355_v20  ;;  %1165 = vmatpush3.bf16.xpose.msra.mxu0 %v710_v43 }
  0x20   : > { %1133 = vmatmul.mubr.msk.bf16.gmra.mrb[4].mxu0 %vm374_vm0, %v356_v25 }
  0x21   : > { %1136 = vmatprep.mubr.msk.bf16.mxu0 %vm374_vm0, %v357_v26 }
  0x28   : > { %1137 = vmatmul.mubr.msk.bf16.gmra.mrb[8].mxu0 %vm374_vm0, %v358_v31 }
  0x29   : > { %1140 = vmatprep.mubr.msk.bf16.mxu0 %vm374_vm0, %v359_v32 }
  0x30   : > { %1141 = vmatmul.mubr.msk.bf16.gmra.mrb[12].mxu0 %vm374_vm0, %v360_v35 }
  0xeb   : > { %v1130_v45 = vpop.f32.mrb[0].mxu0 }
  0xec   : > { %v448_v46 = vadd.f32 %v1130_v45, %v1048_v44  ;;  %v439_v47 = vpop.f32.mrb[1].mxu0 }
  0xed   : > { %v440_v48 = vadd.f32 %v1048_v44, %v439_v47  ;;  %v1131_v49 = vpop.f32.mrb[2].mxu0 }
  0xee   : > { %v451_v50 = vadd.f32 %v1131_v49, %v1048_v44  ;;  %v442_v51 = vpop.f32.mrb[3].mxu0  ;;  %v504_v53 = vmax.f32 %v448_v46, 0.0 }
  0xef   : > { %v443_v52 = vadd.f32 %v1048_v44, %v442_v51  ;;  %v502_v55 = vmax.f32 %v440_v48, 0.0 }
  0xf0   : > { %v505_v54 = vmax.f32 %v451_v50, 0.0 }
  0xf1   : > { %v503_v56 = vmax.f32 %v443_v52, 0.0 }
  0xf2   : > { %v519_v57 = vpack.c.bf16 %v505_v54, %v504_v53 }
  0xf3   : > { %v1134_v58 = vpop.f32.mrb[4].mxu0  ;;  %v518_v59 = vpack.c.bf16 %v503_v56, %v502_v55 }
  0xf4   : > { %v464_v60 = vadd.f32 %v1134_v58, %v1048_v44  ;;  %v455_v61 = vpop.f32.mrb[5].mxu0 }
  0xf5   : > { %v456_v62 = vadd.f32 %v1048_v44, %v455_v61  ;;  %v1135_v63 = vpop.f32.mrb[6].mxu0  ;;  %1148 = vmatprep.mubr.msk.bf16.mxu1 %vm539_vm1, %v518_v59 }
  0xf6   : > { %v467_v0 = vadd.f32 %v1135_v63, %v1048_v44  ;;  %v458_v1 = vpop.f32.mrb[7].mxu0  ;;  %1149 = vmatmul.mubr.msk.bf16.vlgmr.msra.gmra.mrb[0].mxu1 %vm539_vm1, %v519_v57  ;;  %v508_v3 = vmax.f32 %v464_v60, 0.0 }
  0xf7   : > { %v459_v2 = vadd.f32 %v1048_v44, %v458_v1  ;;  %v506_v5 = vmax.f32 %v456_v62, 0.0  ;;  %1183 = vmatpush3.bf16.xpose.msra.mxu1 %v868_v40 }
  0xf8   : > { %v509_v4 = vmax.f32 %v467_v0, 0.0 }
  0xf9   : > { %v507_v6 = vmax.f32 %v459_v2, 0.0 }
  0xfa   : > { %v521_v7 = vpack.c.bf16 %v509_v4, %v508_v3 }
  0xfb   : > { %v520_v8 = vpack.c.bf16 %v507_v6, %v506_v5  ;;  %v1138_v9 = vpop.f32.mrb[8].mxu0 }
  0xfc   : > { %v480_v10 = vadd.f32 %v1138_v9, %v1048_v44  ;;  %v471_v11 = vpop.f32.mrb[9].mxu0 }
  0xfd   : > { %v472_v12 = vadd.f32 %v1048_v44, %v471_v11  ;;  %v1139_v13 = vpop.f32.mrb[10].mxu0  ;;  %1152 = vmatprep.mubr.msk.bf16.mxu1 %vm539_vm1, %v520_v8 }
  0xfe   : > { %v483_v14 = vadd.f32 %v1139_v13, %v1048_v44  ;;  %v474_v15 = vpop.f32.mrb[11].mxu0  ;;  %1153 = vmatmul.mubr.msk.bf16.gmra.mrb[4].mxu1 %vm539_vm1, %v521_v7  ;;  %v512_v17 = vmax.f32 %v480_v10, 0.0 }
  0xff   : > { %v475_v16 = vadd.f32 %v1048_v44, %v474_v15  ;;  %v510_v19 = vmax.f32 %v472_v12, 0.0 }
 0x100   : > { %v513_v18 = vmax.f32 %v483_v14, 0.0 }
 0x101   : > { %v511_v20 = vmax.f32 %v475_v16, 0.0 }
 0x102   : > { %v523_v21 = vpack.c.bf16 %v513_v18, %v512_v17  ;;  %v1066_v18 = vld [vmem:[%s1446_s6] ss:$0 sm:$0xff] }
 0x103   : > { %v522_v22 = vpack.c.bf16 %v511_v20, %v510_v19  ;;  %v1142_v23 = vpop.f32.mrb[12].mxu0 }
 0x104   : > { %v496_v24 = vadd.f32 %v1142_v23, %v1048_v44  ;;  %v487_v25 = vpop.f32.mrb[13].mxu0 }
 0x105   : > { %v488_v26 = vadd.f32 %v1048_v44, %v487_v25  ;;  %v1143_v27 = vpop.f32.mrb[14].mxu0  ;;  %1156 = vmatprep.mubr.msk.bf16.mxu1 %vm539_vm1, %v522_v22 }
 0x106   : > { %v499_v28 = vadd.f32 %v1143_v27, %v1048_v44  ;;  %v490_v29 = vpop.f32.mrb[15].mxu0  ;;  %1157 = vmatmul.mubr.msk.bf16.gmra.mrb[8].mxu1 %vm539_vm1, %v523_v21  ;;  %v516_v31 = vmax.f32 %v496_v24, 0.0 }
 0x107   : > { %v491_v30 = vadd.f32 %v1048_v44, %v490_v29  ;;  %v514_v33 = vmax.f32 %v488_v26, 0.0 }
 0x108   : > { %v517_v32 = vmax.f32 %v499_v28, 0.0 }
 0x109   : > { %v515_v34 = vmax.f32 %v491_v30, 0.0 }
 0x10a   : > { %v525_v35 = vpack.c.bf16 %v517_v32, %v516_v31 }
 0x10b   : > { %v524_v36 = vpack.c.bf16 %v515_v34, %v514_v33 }
 0x10d   : > { %1160 = vmatprep.mubr.msk.bf16.mxu1 %vm539_vm1, %v524_v36 }
 0x10e   : > { %1161 = vmatmul.mubr.msk.bf16.gmra.mrb[12].mxu1 %vm539_vm1, %v525_v35 }
 0x1c9   : > { %v1150_v41 = vpop.f32.mrb[0].mxu1 }
 0x1ca   : > { %v604_v43 = vpop.f32.mrb[1].mxu1  ;;  %v613_v45 = vadd.f32 %v1150_v41, %v1057_v42 }
 0x1cb   : > { %v1151_v44 = vpop.f32.mrb[2].mxu1  ;;  %v605_v48 = vadd.f32 %v1057_v42, %v604_v43 }
 0x1cc   : > { %v616_v46 = vadd.f32 %v1151_v44, %v1057_v42  ;;  %v607_v47 = vpop.f32.mrb[3].mxu1 }
 0x1cd   : > { %v608_v49 = vadd.f32 %v1057_v42, %v607_v47 }
 0x1ce   : > { %v668_v50 = vpack.c.bf16 %v616_v46, %v613_v45 }
 0x1cf   : > { %v667_v51 = vpack.c.bf16 %v608_v49, %v605_v48 }
 0x1d1   : > { %v1154_v52 = vpop.f32.mrb[4].mxu1  ;;  %1166 = vmatprep.mubr.msk.bf16.mxu0 %vm539_vm1, %v667_v51 }
 0x1d2   : > { %v620_v53 = vpop.f32.mrb[5].mxu1  ;;  %1167 = vmatmul.mubr.msk.bf16.vlgmr.msra.gmra.mrb[16].mxu0 %vm539_vm1, %v668_v50  ;;  %v629_v55 = vadd.f32 %v1154_v52, %v1057_v42 }
 0x1d3   : > { %v1155_v54 = vpop.f32.mrb[6].mxu1  ;;  %v621_v58 = vadd.f32 %v1057_v42, %v620_v53 }
 0x1d4   : > { %v632_v56 = vadd.f32 %v1155_v54, %v1057_v42  ;;  %v623_v57 = vpop.f32.mrb[7].mxu1 }
 0x1d5   : > { %v624_v59 = vadd.f32 %v1057_v42, %v623_v57 }
 0x1d6   : > { %v670_v60 = vpack.c.bf16 %v632_v56, %v629_v55 }
 0x1d7   : > { %v669_v61 = vpack.c.bf16 %v624_v59, %v621_v58 }
 0x1d9   : > { %v1158_v62 = vpop.f32.mrb[8].mxu1  ;;  %1170 = vmatprep.mubr.msk.bf16.mxu0 %vm539_vm1, %v669_v61 }
 0x1da   : > { %v636_v63 = vpop.f32.mrb[9].mxu1  ;;  %1171 = vmatmul.mubr.msk.bf16.gmra.mrb[20].mxu0 %vm539_vm1, %v670_v60  ;;  %v645_v1 = vadd.f32 %v1158_v62, %v1057_v42 }
 0x1db   : > { %v1159_v0 = vpop.f32.mrb[10].mxu1  ;;  %v637_v4 = vadd.f32 %v1057_v42, %v636_v63 }
 0x1dc   : > { %v648_v2 = vadd.f32 %v1159_v0, %v1057_v42  ;;  %v639_v3 = vpop.f32.mrb[11].mxu1 }
 0x1dd   : > { %v640_v5 = vadd.f32 %v1057_v42, %v639_v3 }
 0x1de   : > { %v672_v6 = vpack.c.bf16 %v648_v2, %v645_v1 }
 0x1df   : > { %v671_v7 = vpack.c.bf16 %v640_v5, %v637_v4 }
 0x1e1   : > { %v1162_v8 = vpop.f32.mrb[12].mxu1  ;;  %1174 = vmatprep.mubr.msk.bf16.mxu0 %vm539_vm1, %v671_v7 }
 0x1e2   : > { %v652_v9 = vpop.f32.mrb[13].mxu1  ;;  %1175 = vmatmul.mubr.msk.bf16.gmra.mrb[24].mxu0 %vm539_vm1, %v672_v6  ;;  %v661_v11 = vadd.f32 %v1162_v8, %v1057_v42 }
 0x1e3   : > { %v1163_v10 = vpop.f32.mrb[14].mxu1  ;;  %v653_v14 = vadd.f32 %v1057_v42, %v652_v9 }
 0x1e4   : > { %v664_v12 = vadd.f32 %v1163_v10, %v1057_v42  ;;  %v655_v13 = vpop.f32.mrb[15].mxu1 }
 0x1e5   : > { %v656_v15 = vadd.f32 %v1057_v42, %v655_v13 }
 0x1e6   : > { %v674_v16 = vpack.c.bf16 %v664_v12, %v661_v11  ;;  %v1075_v11 = vld [vmem:[%s1448_s8] ss:$0 sm:$0xff] }
 0x1e7   : > { %v673_v17 = vpack.c.bf16 %v656_v15, %v653_v14 }
 0x1e9   : > { %1178 = vmatprep.mubr.msk.bf16.mxu0 %vm539_vm1, %v673_v17 }
 0x1ea   : > { %1179 = vmatmul.mubr.msk.bf16.gmra.mrb[28].mxu0 %vm539_vm1, %v674_v16 }
 0x2a5   : > { %v1168_v19 = vpop.f32.mrb[16].mxu0 }
 0x2a6   : > { %v755_v20 = vadd.f32 %v1168_v19, %v1066_v18  ;;  %v746_v21 = vpop.f32.mrb[17].mxu0 }
 0x2a7   : > { %v747_v22 = vadd.f32 %v1066_v18, %v746_v21  ;;  %v1169_v23 = vpop.f32.mrb[18].mxu0 }
 0x2a8   : > { %v758_v24 = vadd.f32 %v1169_v23, %v1066_v18  ;;  %v749_v25 = vpop.f32.mrb[19].mxu0  ;;  %v811_v27 = vmax.f32 %v755_v20, 0.0 }
 0x2a9   : > { %v750_v26 = vadd.f32 %v1066_v18, %v749_v25  ;;  %v809_v29 = vmax.f32 %v747_v22, 0.0 }
 0x2aa   : > { %v812_v28 = vmax.f32 %v758_v24, 0.0 }
 0x2ab   : > { %v810_v30 = vmax.f32 %v750_v26, 0.0 }
 0x2ac   : > { %v826_v31 = vpack.c.bf16 %v812_v28, %v811_v27 }
 0x2ad   : > { %v825_v32 = vpack.c.bf16 %v810_v30, %v809_v29  ;;  %v1172_v33 = vpop.f32.mrb[20].mxu0 }
 0x2ae   : > { %v771_v34 = vadd.f32 %v1172_v33, %v1066_v18  ;;  %v762_v35 = vpop.f32.mrb[21].mxu0 }
 0x2af   : > { %v763_v36 = vadd.f32 %v1066_v18, %v762_v35  ;;  %v1173_v37 = vpop.f32.mrb[22].mxu0  ;;  %1184 = vmatprep.mubr.msk.bf16.mxu1 %vm374_vm0, %v825_v32 }
 0x2b0   : > { %v774_v38 = vadd.f32 %v1173_v37, %v1066_v18  ;;  %v765_v39 = vpop.f32.mrb[23].mxu0  ;;  %1185 = vmatmul.mubr.msk.bf16.vlgmr.msra.gmra.mrb[16].mxu1 %vm374_vm0, %v826_v31  ;;  %v815_v41 = vmax.f32 %v771_v34, 0.0 }
 0x2b1   : > { %v766_v40 = vadd.f32 %v1066_v18, %v765_v39  ;;  %v813_v43 = vmax.f32 %v763_v36, 0.0 }
 0x2b2   : > { %v816_v42 = vmax.f32 %v774_v38, 0.0 }
 0x2b3   : > { %v814_v44 = vmax.f32 %v766_v40, 0.0 }
 0x2b4   : > { %v828_v45 = vpack.c.bf16 %v816_v42, %v815_v41 }
 0x2b5   : > { %v827_v46 = vpack.c.bf16 %v814_v44, %v813_v43  ;;  %v1176_v47 = vpop.f32.mrb[24].mxu0 }
 0x2b6   : > { %v787_v48 = vadd.f32 %v1176_v47, %v1066_v18  ;;  %v778_v49 = vpop.f32.mrb[25].mxu0 }
 0x2b7   : > { %v779_v50 = vadd.f32 %v1066_v18, %v778_v49  ;;  %v1177_v51 = vpop.f32.mrb[26].mxu0  ;;  %1188 = vmatprep.mubr.msk.bf16.mxu1 %vm374_vm0, %v827_v46 }
 0x2b8   : > { %v790_v52 = vadd.f32 %v1177_v51, %v1066_v18  ;;  %v781_v53 = vpop.f32.mrb[27].mxu0  ;;  %1189 = vmatmul.mubr.msk.bf16.gmra.mrb[20].mxu1 %vm374_vm0, %v828_v45  ;;  %v819_v55 = vmax.f32 %v787_v48, 0.0 }
 0x2b9   : > { %v782_v54 = vadd.f32 %v1066_v18, %v781_v53  ;;  %v817_v57 = vmax.f32 %v779_v50, 0.0 }
 0x2ba   : > { %v820_v56 = vmax.f32 %v790_v52, 0.0 }
 0x2bb   : > { %v818_v58 = vmax.f32 %v782_v54, 0.0 }
 0x2bc   : > { %v830_v59 = vpack.c.bf16 %v820_v56, %v819_v55 }
 0x2bd   : > { %v829_v60 = vpack.c.bf16 %v818_v58, %v817_v57  ;;  %v1180_v61 = vpop.f32.mrb[28].mxu0 }
 0x2be   : > { %v803_v62 = vadd.f32 %v1180_v61, %v1066_v18  ;;  %v794_v63 = vpop.f32.mrb[29].mxu0 }
 0x2bf   : > { %v795_v0 = vadd.f32 %v1066_v18, %v794_v63  ;;  %v1181_v1 = vpop.f32.mrb[30].mxu0  ;;  %1192 = vmatprep.mubr.msk.bf16.mxu1 %vm374_vm0, %v829_v60 }
 0x2c0   : > { %v806_v2 = vadd.f32 %v1181_v1, %v1066_v18  ;;  %v797_v3 = vpop.f32.mrb[31].mxu0  ;;  %1193 = vmatmul.mubr.msk.bf16.gmra.mrb[24].mxu1 %vm374_vm0, %v830_v59  ;;  %v823_v5 = vmax.f32 %v803_v62, 0.0 }
 0x2c1   : > { %v798_v4 = vadd.f32 %v1066_v18, %v797_v3  ;;  %v821_v7 = vmax.f32 %v795_v0, 0.0 }
 0x2c2   : > { %v824_v6 = vmax.f32 %v806_v2, 0.0 }
 0x2c3   : > { %v822_v8 = vmax.f32 %v798_v4, 0.0 }
 0x2c4   : > { %v832_v9 = vpack.c.bf16 %v824_v6, %v823_v5 }
 0x2c5   : > { %v831_v10 = vpack.c.bf16 %v822_v8, %v821_v7 }
 0x2c7   : > { %1196 = vmatprep.mubr.msk.bf16.mxu1 %vm374_vm0, %v831_v10 }
 0x2c8   : > { %1197 = vmatmul.mubr.msk.bf16.gmra.mrb[28].mxu1 %vm374_vm0, %v832_v9 }
 0x383   : > { %v1186_v12 = vpop.f32.mrb[16].mxu1 }
 0x384   : > { %v913_v13 = vadd.f32 %v1186_v12, %v1075_v11  ;;  %v904_v14 = vpop.f32.mrb[17].mxu1 }
 0x385   : > { %v905_v15 = vadd.f32 %v1075_v11, %v904_v14  ;;  %v1187_v16 = vpop.f32.mrb[18].mxu1 }
 0x386   : > { %969 = vst.msk [vmem:[%s1403_s12 + $0x10] sm:$0xff] %vm374_vm0, %v913_v13  ;;  %v916_v17 = vadd.f32 %v1187_v16, %v1075_v11  ;;  %v907_v18 = vpop.f32.mrb[19].mxu1 }
 0x387   : > { %967 = vst.msk [vmem:[%s1403_s12] sm:$0xff] %vm374_vm0, %v905_v15  ;;  %v908_v19 = vadd.f32 %v1075_v11, %v907_v18 }
 0x388   : > { %970 = vst.msk [vmem:[%s1403_s12 + $0x18] sm:$0xff] %vm374_vm0, %v916_v17 }
 0x389   : > { %968 = vst.msk [vmem:[%s1403_s12 + $0x8] sm:$0xff] %vm374_vm0, %v908_v19 }
 0x38b   : > { %v1190_v20 = vpop.f32.mrb[20].mxu1 }
 0x38c   : > { %v929_v21 = vadd.f32 %v1190_v20, %v1075_v11  ;;  %v920_v22 = vpop.f32.mrb[21].mxu1 }
 0x38d   : > { %v921_v23 = vadd.f32 %v1075_v11, %v920_v22  ;;  %v1191_v24 = vpop.f32.mrb[22].mxu1 }
 0x38e   : > { %973 = vst.msk [vmem:[%s1403_s12 + $0x30] sm:$0xff] %vm374_vm0, %v929_v21  ;;  %v932_v25 = vadd.f32 %v1191_v24, %v1075_v11  ;;  %v923_v26 = vpop.f32.mrb[23].mxu1 }
 0x38f   : > { %971 = vst.msk [vmem:[%s1403_s12 + $0x20] sm:$0xff] %vm374_vm0, %v921_v23  ;;  %v924_v27 = vadd.f32 %v1075_v11, %v923_v26 }
 0x390   : > { %974 = vst.msk [vmem:[%s1403_s12 + $0x38] sm:$0xff] %vm374_vm0, %v932_v25 }
 0x391   : > { %972 = vst.msk [vmem:[%s1403_s12 + $0x28] sm:$0xff] %vm374_vm0, %v924_v27 }
 0x393   : > { %v1194_v28 = vpop.f32.mrb[24].mxu1 }
 0x394   : > { %v945_v29 = vadd.f32 %v1194_v28, %v1075_v11  ;;  %v936_v30 = vpop.f32.mrb[25].mxu1 }
 0x395   : > { %v937_v31 = vadd.f32 %v1075_v11, %v936_v30  ;;  %v1195_v32 = vpop.f32.mrb[26].mxu1 }
 0x396   : > { %977 = vst.msk [vmem:[%s1403_s12 + $0x50] sm:$0xff] %vm374_vm0, %v945_v29  ;;  %v948_v33 = vadd.f32 %v1195_v32, %v1075_v11  ;;  %v939_v34 = vpop.f32.mrb[27].mxu1 }
 0x397   : > { %975 = vst.msk [vmem:[%s1403_s12 + $0x40] sm:$0xff] %vm374_vm0, %v937_v31  ;;  %v940_v35 = vadd.f32 %v1075_v11, %v939_v34 }
 0x398   : > { %978 = vst.msk [vmem:[%s1403_s12 + $0x58] sm:$0xff] %vm374_vm0, %v948_v33 }
 0x399   : > { %976 = vst.msk [vmem:[%s1403_s12 + $0x48] sm:$0xff] %vm374_vm0, %v940_v35 }
 0x39b   : > { %v1198_v36 = vpop.f32.mrb[28].mxu1 }
 0x39c   : > { %v961_v37 = vadd.f32 %v1198_v36, %v1075_v11  ;;  %v952_v38 = vpop.f32.mrb[29].mxu1 }
 0x39d   : > { %v953_v39 = vadd.f32 %v1075_v11, %v952_v38  ;;  %v1199_v40 = vpop.f32.mrb[30].mxu1 }
 0x39e   : > { %981 = vst.msk [vmem:[%s1403_s12 + $0x70] sm:$0xff] %vm374_vm0, %v961_v37  ;;  %v964_v41 = vadd.f32 %v1199_v40, %v1075_v11  ;;  %v955_v42 = vpop.f32.mrb[31].mxu1 }
 0x39f   : > { %979 = vst.msk [vmem:[%s1403_s12 + $0x60] sm:$0xff] %vm374_vm0, %v953_v39  ;;  %v956_v43 = vadd.f32 %v1075_v11, %v955_v42 }
 0x3a0   : > { %982 = vst.msk [vmem:[%s1403_s12 + $0x78] sm:$0xff] %vm374_vm0, %v964_v41 }
 0x3a1   : > { %980 = vst.msk [vmem:[%s1403_s12 + $0x68] sm:$0xff] %vm374_vm0, %v956_v43 }
 0x3a2 PF: > { %s19_s30 = sadd.s32 1, %s1220_s30  }
 0x3a3   : > { %p16_p4 = scmp.ge.s32.totalorder %s19_s30, 4  }
 0x3a5   :  { %18 = sbr.rel (!%p16_p4) target bundleno = 1 (0x1), region = 86 }

</bundles_post_ra>
